<compile_context>
chip_gen: v7x
topology: tpu7x:2x2x1
jax: 0.10.0
libtpu: 0.0.40
codegen_flags: <defaults>
</compile_context>

<pallas_src>
import functools
from typing import NamedTuple

import jax
import jax.numpy as jnp
from jax.experimental import pallas as pl
from jax.experimental.pallas import tpu as pltpu


def _round_up(x, m):
    return ((x + m - 1) // m) * m


class FCParams(NamedTuple):
    w1: jax.Array    # (D_pad, D_pad), stored (in, out)
    w2: jax.Array    # (D_pad, D_pad)
    w3: jax.Array    # (D_pad, C_pad)
    bias: jax.Array  # (3, max(D_pad, C_pad)) f32: rows = b1, b2, b3


# ---------------------------------------------------------------------------
# Capability / hardware probes (run eagerly, cached).
# ---------------------------------------------------------------------------

@functools.lru_cache(maxsize=None)
def _vmem_capacity_bytes():
    try:
        return int(pltpu.get_tpu_info().vmem_capacity_bytes)
    except Exception:
        return 64 << 20  # conservative default: v7x has 64 MiB per TensorCore


@functools.lru_cache(maxsize=None)
def _buffered_one_supported():
    """Probe whether pipeline_mode=pl.Buffered(1) is accepted by this JAX/TPU.

    Run eagerly (from prepare_params) so the result is a cached Python bool by
    the time the jitted forward traces."""
    try:
        def _k(a_ref, b_ref, o_ref):
            o_ref[...] = a_ref[...] + b_ref[...]

        f = pl.pallas_call(
            _k,
            out_shape=jax.ShapeDtypeStruct((16, 128), jnp.float32),
            grid=(2,),
            in_specs=[
                pl.BlockSpec((8, 128), lambda i: (i, 0)),
                pl.BlockSpec((8, 128), lambda i: (0, 0),
                             pipeline_mode=pl.Buffered(1)),
            ],
            out_specs=pl.BlockSpec((8, 128), lambda i: (i, 0)),
        )
        jax.block_until_ready(f(jnp.ones((16, 128), jnp.float32),
                                jnp.ones((8, 128), jnp.float32)))
        return True
    except Exception:
        return False


# ---------------------------------------------------------------------------
# One-time parameter preparation (hoisted out of the forward pass).
# ---------------------------------------------------------------------------

def prepare_params(w1, b1, w2, b2, w3, b3, *, weight_dtype=None):
    """Pad weights to lane-aligned shapes and pack the three biases into one
    slab. Call once; re-padding per forward call would cost as much HBM
    traffic as the kernel's own weight streaming."""
    D = w1.shape[0]
    C = w3.shape[1]
    D_pad = _round_up(D, 128)
    C_pad = _round_up(C, 128)
    P = max(D_pad, C_pad)
    wdt = w1.dtype if weight_dtype is None else weight_dtype

    w1p = jnp.zeros((D_pad, D_pad), wdt).at[:D, :D].set(w1.astype(wdt))
    w2p = jnp.zeros((D_pad, D_pad), wdt).at[:D, :D].set(w2.astype(wdt))
    w3p = jnp.zeros((D_pad, C_pad), wdt).at[:D, :C].set(w3.astype(wdt))

    bias = jnp.zeros((3, P), jnp.float32)
    bias = bias.at[0, :D].set(b1.reshape(-1).astype(jnp.float32))
    bias = bias.at[1, :D].set(b2.reshape(-1).astype(jnp.float32))
    bias = bias.at[2, :C].set(b3.reshape(-1).astype(jnp.float32))

    # Warm the capability caches eagerly (outside any jit trace).
    _buffered_one_supported()
    _vmem_capacity_bytes()
    return FCParams(w1=w1p, w2=w2p, w3=w3p, bias=bias), D, C


# ---------------------------------------------------------------------------
# Fused resident-weight kernel (small / medium inp_dim).
# ---------------------------------------------------------------------------

def _fused_fc_kernel(x_ref, w1_ref, w2_ref, w3_ref, bias_ref, o_ref):
    d = w1_ref.shape[1]          # padded inp_dim
    c = w3_ref.shape[1]          # padded classes
    mxu_dt = w1_ref.dtype        # bf16 fast path when params stored in bf16

    # Layer 1: Linear + ReLU. MXU accumulates in f32; bias/ReLU on the VPU in f32.
    h = jnp.dot(x_ref[...].astype(mxu_dt), w1_ref[...],
                preferred_element_type=jnp.float32)
    h = jnp.maximum(h + bias_ref[0:1, :d], 0.0)

    # Layer 2: Linear.
    h = jnp.dot(h.astype(mxu_dt), w2_ref[...],
                preferred_element_type=jnp.float32)
    h = h + bias_ref[1:2, :d]

    # Layer 3 (fc_net): Linear(inp_dim, classes).
    out = jnp.dot(h.astype(mxu_dt), w3_ref[...],
                  preferred_element_type=jnp.float32)
    out = out + bias_ref[2:3, :c]

    # Lane-dense store: o_ref's last dim is a multiple of 128 (no vst.msk).
    o_ref[...] = out.astype(o_ref.dtype)


def _pick_block_batch(B, D_pad, C_pad, resident_bytes, x_itemsize,
                      out_itemsize, budget):
    def io_bytes(c):  # double-buffered x tile + out tile
        return 2 * c * (D_pad * x_itemsize + C_pad * out_itemsize)

    if B <= 128:
        c = _round_up(B, 8)  # single tile, no over-padding
        return c if resident_bytes + io_bytes(c) <= budget else None

    b128 = _round_up(B, 128)
    # Largest MXU-aligned tile that divides the 128-aligned batch and fits VMEM.
    for c in (1024, 512, 256, 128):
        if b128 % c == 0 and resident_bytes + io_bytes(c) <= budget:
            return c
    return None


def _fc_fused(x, params, classes, block_batch, resident_bytes, phys_vmem):
    B, D = x.shape
    D_pad = params.w1.shape[0]
    C_pad = params.w3.shape[1]
    out_dtype = x.dtype
    x_itm = x.dtype.itemsize
    out_itm = out_dtype.itemsize

    B_pad = _round_up(B, block_batch)
    if (B_pad, D_pad) == (B, D):
        xp = x                                   # already aligned: no pad copy
    else:
        xp = jnp.zeros((B_pad, D_pad), x.dtype).at[:B, :D].set(x)

    num_tiles = B_pad // block_batch
    # Only split the batch across TensorCores when there are >= 2 sizable
    # tiles; otherwise each TC would DMA its own copy of the resident weights.
    batch_sem = "parallel" if (num_tiles >= 2 and block_batch >= 128) else "arbitrary"

    need = resident_bytes + 2 * block_batch * (D_pad * x_itm + C_pad * out_itm)
    vmem_limit = int(min(max(int(need * 1.25) + (4 << 20), 32 << 20),
                         int(phys_vmem * 0.9)))

    flops = 2 * B_pad * (2 * D_pad * D_pad + D_pad * C_pad)
    bytes_accessed = (B_pad * D_pad * x_itm
                      + (2 * D_pad * D_pad + D_pad * C_pad) * params.w1.dtype.itemsize
                      + params.bias.size * params.bias.dtype.itemsize
                      + B_pad * C_pad * out_itm)

    use_buffered = _buffered_one_supported()

    def _resident_spec(shape):
        # Constant index_map -> never re-DMA'd; Buffered(1) also halves the
        # resident VMEM footprint (no second buffer) when supported.
        if use_buffered:
            return pl.BlockSpec(shape, lambda i: (0, 0),
                                pipeline_mode=pl.Buffered(1))
        return pl.BlockSpec(shape, lambda i: (0, 0))

    out_padded = pl.pallas_call(
        _fused_fc_kernel,
        out_shape=jax.ShapeDtypeStruct((B_pad, C_pad), out_dtype),
        grid=(num_tiles,),
        in_specs=[
            pl.BlockSpec((block_batch, D_pad), lambda i: (i, 0)),   # x (pipelined)
            _resident_spec((D_pad, D_pad)),                          # w1
            _resident_spec((D_pad, D_pad)),                          # w2
            _resident_spec((D_pad, C_pad)),                          # w3
            _resident_spec((3, params.bias.shape[1])),               # bias slab
        ],
        out_specs=pl.BlockSpec((block_batch, C_pad), lambda i: (i, 0)),
        compiler_params=pltpu.CompilerParams(
            dimension_semantics=(batch_sem,),
            vmem_limit_bytes=vmem_limit),
        cost_estimate=pl.CostEstimate(flops=flops, transcendentals=0,
                                      bytes_accessed=bytes_accessed),
    )(xp, params.w1, params.w2, params.w3, params.bias)

    return out_padded[:B, :classes]


# ---------------------------------------------------------------------------
# Streaming fallback: per-layer K-tiled matmul (large inp_dim / v7x 64 MiB).
# ---------------------------------------------------------------------------

def _linear_kernel(x_ref, w_ref, b_ref, o_ref, acc_ref, *, relu):
    @pl.when(pl.program_id(2) == 0)
    def _init():
        acc_ref[...] = jnp.zeros_like(acc_ref)

    acc_ref[...] += jnp.dot(x_ref[...].astype(w_ref.dtype), w_ref[...],
                            preferred_element_type=jnp.float32)

    @pl.when(pl.program_id(2) == pl.num_programs(2) - 1)
    def _done():
        r = acc_ref[...] + b_ref[...]
        if relu:
            r = jnp.maximum(r, 0.0)
        o_ref[...] = r.astype(o_ref.dtype)


def _linear(x, w, b, *, relu, out_dtype, bm, phys_vmem):
    M, K = x.shape
    N = w.shape[1]
    bn = next(t for t in (512, 256, 128) if N % t == 0)
    bk = next(t for t in (512, 256, 128) if K % t == 0)
    grid = (M // bm, N // bn, K // bk)

    x_itm, w_itm, o_itm = x.dtype.itemsize, w.dtype.itemsize, out_dtype.itemsize
    need = (2 * (bm * bk * x_itm + bk * bn * w_itm + bn * 4 + bm * bn * o_itm)
            + bm * bn * 4 + (4 << 20))
    vmem_limit = int(min(max(need, 32 << 20), int(phys_vmem * 0.9)))

    return pl.pallas_call(
        functools.partial(_linear_kernel, relu=relu),
        out_shape=jax.ShapeDtypeStruct((M, N), out_dtype),
        grid=grid,
        in_specs=[
            pl.BlockSpec((bm, bk), lambda i, j, k: (i, k)),
            pl.BlockSpec((bk, bn), lambda i, j, k: (k, j)),
            pl.BlockSpec((1, bn), lambda i, j, k: (0, j)),
        ],
        out_specs=pl.BlockSpec((bm, bn), lambda i, j, k: (i, j)),
        scratch_shapes=[pltpu.VMEM((bm, bn), jnp.float32)],
        compiler_params=pltpu.CompilerParams(
            dimension_semantics=("parallel", "parallel", "arbitrary"),
            vmem_limit_bytes=vmem_limit),
        cost_estimate=pl.CostEstimate(
            flops=2 * M * N * K, transcendentals=0,
            bytes_accessed=M * K * x_itm + K * N * w_itm + N * 4 + M * N * o_itm),
    )(x, w, b)


def _fc_streaming(x, params, classes, phys_vmem):
    # TODO(synk): a single fused kernel with an in-body emit_pipeline over the
    # weight K-slabs would avoid writing the two intermediate activations back
    # to HBM; at the sizes where this path triggers it is weight-DMA bound, so
    # per-layer K-tiled matmuls are already close to the roofline.
    B, D = x.shape
    D_pad = params.w1.shape[0]
    C_pad = params.w3.shape[1]
    out_dtype = x.dtype

    if B <= 128:
        bm = _round_up(B, 8)
    else:
        bm = 256 if _round_up(B, 128) % 256 == 0 else 128
    B_pad = _round_up(B, bm)

    if (B_pad, D_pad) == (B, D):
        xp = x
    else:
        xp = jnp.zeros((B_pad, D_pad), x.dtype).at[:B, :D].set(x)

    b1 = params.bias[0:1, :D_pad]
    b2 = params.bias[1:2, :D_pad]
    b3 = params.bias[2:3, :C_pad]

    h = _linear(xp, params.w1, b1, relu=True, out_dtype=params.w1.dtype,
                bm=bm, phys_vmem=phys_vmem)
    h = _linear(h, params.w2, b2, relu=False, out_dtype=params.w1.dtype,
                bm=bm, phys_vmem=phys_vmem)
    out = _linear(h, params.w3, b3, relu=False, out_dtype=out_dtype,
                  bm=bm, phys_vmem=phys_vmem)
    return out[:B, :classes]


# ---------------------------------------------------------------------------
# Public forward.
# ---------------------------------------------------------------------------

def fc_forward(x, params, classes, *, force_streaming=False):
    """y = (ReLU(x @ w1 + b1) @ w2 + b2) @ w3 + b3  (same math as the PyTorch
    module with weights stored pre-transposed as (in, out))."""
    B, D = x.shape
    D_pad = params.w1.shape[0]
    C_pad = params.w3.shape[1]

    w_itm = params.w1.dtype.itemsize
    weight_buffers = 1 if _buffered_one_supported() else 2
    resident_bytes = weight_buffers * (
        (2 * D_pad * D_pad + D_pad * C_pad) * w_itm
        + params.bias.size * params.bias.dtype.itemsize)

    phys_vmem = _vmem_capacity_bytes()
    budget = int(phys_vmem * 0.85)

    block_batch = None
    if not force_streaming:
        block_batch = _pick_block_batch(B, D_pad, C_pad, resident_bytes,
                                        x.dtype.itemsize, x.dtype.itemsize,
                                        budget)
    if block_batch is not None:
        return _fc_fused(x, params, classes, block_batch, resident_bytes,
                         phys_vmem)
    return _fc_streaming(x, params, classes, phys_vmem)


def init_params(key, inp_dim, classes, dtype=jnp.float32):
    """Deterministic parameter init (same shapes as the PyTorch module, but
    weights stored as (in, out))."""
    ks = jax.random.split(key, 6)
    s = 1.0 / jnp.sqrt(inp_dim)
    w1 = jax.random.uniform(ks[0], (inp_dim, inp_dim), dtype, -s, s)
    b1 = jax.random.uniform(ks[1], (1, inp_dim), dtype, -s, s)
    w2 = jax.random.uniform(ks[2], (inp_dim, inp_dim), dtype, -s, s)
    b2 = jax.random.uniform(ks[3], (1, inp_dim), dtype, -s, s)
    w3 = jax.random.uniform(ks[4], (inp_dim, classes), dtype, -s, s)
    b3 = jax.random.uniform(ks[5], (1, classes), dtype, -s, s)
    return w1, b1, w2, b2, w3, b3


if __name__ == "__main__":
    batch, inp_dim, classes = 8, 32, 8

    key = jax.random.PRNGKey(0)
    kx, kp = jax.random.split(key)
    x = jax.random.normal(kx, (batch, inp_dim), jnp.float32)
    w1, b1, w2, b2, w3, b3 = init_params(kp, inp_dim, classes)

    # Plain-JAX reference (same math as the PyTorch module).
    ref = jnp.maximum(x @ w1 + b1, 0.0) @ w2 + b2
    ref = ref @ w3 + b3

    fwd = jax.jit(fc_forward, static_argnums=(2,),
                  static_argnames=("force_streaming",))

    # 1) Fused resident-weight path (f32 params).
    params, _, _ = prepare_params(w1, b1, w2, b2, w3, b3)
    out = jax.block_until_ready(fwd(x, params, classes))
    assert out.shape == (batch, classes)
    assert jnp.allclose(out, ref, atol=1e-5, rtol=1e-5)

    # 2) Streaming (per-layer K-tiled) fallback used for large inp_dim on
    #    64 MiB-VMEM parts — forced here at small shapes to keep it covered.
    out_s = jax.block_until_ready(fwd(x, params, classes, force_streaming=True))
    assert jnp.allclose(out_s, ref, atol=1e-5, rtol=1e-5)

    # 3) bf16-weight fast path for the memory-bound small-batch regime
    #    (f32 accumulation; looser tolerance vs. the all-f32 reference).
    params_bf16, _, _ = prepare_params(w1, b1, w2, b2, w3, b3,
                                       weight_dtype=jnp.bfloat16)
    out_b = jax.block_until_ready(fwd(x, params_bf16, classes))
    assert jnp.allclose(out_b.astype(jnp.float32), ref, atol=1e-1, rtol=1e-1)

    print("KERNEL_OK")
</pallas_src>

<mosaic_0001>
module attributes {stable_mosaic.version = 11 : i64} {
  func.func @_k(%arg0: i32, %arg1: memref<8x128xf32, #tpu.memory_space<vmem>>, %arg2: memref<8x128xf32, #tpu.memory_space<vmem>>, %arg3: memref<8x128xf32, #tpu.memory_space<vmem>>) attributes {dimension_semantics = [#tpu.dimension_semantics<arbitrary>], iteration_bounds = array<i64: 2>, scalar_prefetch = 0 : i64, scratch_operands = 0 : i64, tpu.core_type = #tpu.core_type<tc>, window_params = [{transform_indices = @transform_0, window_bounds = array<i64: 8, 128>}, {pipeline_mode = #tpu.pipeline_mode<synchronous>, transform_indices = @transform_1, window_bounds = array<i64: 8, 128>}, {transform_indices = @transform_2, window_bounds = array<i64: 8, 128>}]} {
    %c0 = arith.constant 0 : index
    %c0_0 = arith.constant 0 : index
    %0 = vector.load %arg1[%c0, %c0_0] : memref<8x128xf32, #tpu.memory_space<vmem>>, vector<8x128xf32>
    %c0_1 = arith.constant 0 : index
    %c0_2 = arith.constant 0 : index
    %1 = vector.load %arg2[%c0_1, %c0_2] : memref<8x128xf32, #tpu.memory_space<vmem>>, vector<8x128xf32>
    %2 = arith.addf %0, %1 : vector<8x128xf32>
    %c0_3 = arith.constant 0 : index
    %c0_4 = arith.constant 0 : index
    %3 = vector.load %arg3[%c0_3, %c0_4] : memref<8x128xf32, #tpu.memory_space<vmem>>, vector<8x128xf32>
    tpu.vector_store %arg3[%c0_3, %c0_4], %2 {strides = array<i32>} : memref<8x128xf32, #tpu.memory_space<vmem>>, vector<8x128xf32>,
    return
  }
  func.func @transform_0(%arg0: i32) -> (i32, i32) {
    %c0_i32 = arith.constant 0 : i32
    %c0_i32_0 = arith.constant 0 : i32
    return %arg0, %c0_i32 : i32, i32
  }
  func.func @transform_1(%arg0: i32) -> (i32, i32) {
    %c0_i32 = arith.constant 0 : i32
    %c0_i32_0 = arith.constant 0 : i32
    %c0_i32_1 = arith.constant 0 : i32
    return %c0_i32, %c0_i32_0 : i32, i32
  }
  func.func @transform_2(%arg0: i32) -> (i32, i32) {
    %c0_i32 = arith.constant 0 : i32
    %c0_i32_0 = arith.constant 0 : i32
    return %arg0, %c0_i32 : i32, i32
  }
}

module attributes {stable_mosaic.version = 11 : i64} {
  func.func @_fused_fc_kernel(%arg0: i32, %arg1: memref<8x128xf32, #tpu.memory_space<vmem>>, %arg2: memref<128x128xf32, #tpu.memory_space<vmem>>, %arg3: memref<128x128xf32, #tpu.memory_space<vmem>>, %arg4: memref<128x128xf32, #tpu.memory_space<vmem>>, %arg5: memref<3x128xf32, #tpu.memory_space<vmem>>, %arg6: memref<8x128xf32, #tpu.memory_space<vmem>>) attributes {dimension_semantics = [#tpu.dimension_semantics<arbitrary>], iteration_bounds = array<i64: 1>, scalar_prefetch = 0 : i64, scratch_operands = 0 : i64, tpu.core_type = #tpu.core_type<tc>, window_params = [{transform_indices = @transform_0, window_bounds = array<i64: 8, 128>}, {pipeline_mode = #tpu.pipeline_mode<synchronous>, transform_indices = @transform_1, window_bounds = array<i64: 128, 128>}, {pipeline_mode = #tpu.pipeline_mode<synchronous>, transform_indices = @transform_2, window_bounds = array<i64: 128, 128>}, {pipeline_mode = #tpu.pipeline_mode<synchronous>, transform_indices = @transform_3, window_bounds = array<i64: 128, 128>}, {pipeline_mode = #tpu.pipeline_mode<synchronous>, transform_indices = @transform_4, window_bounds = array<i64: 3, 128>}, {transform_indices = @transform_5, window_bounds = array<i64: 8, 128>}]} {
    %c0 = arith.constant 0 : index
    %c0_0 = arith.constant 0 : index
    %0 = vector.load %arg1[%c0, %c0_0] : memref<8x128xf32, #tpu.memory_space<vmem>>, vector<8x128xf32>
    %c0_1 = arith.constant 0 : index
    %c0_2 = arith.constant 0 : index
    %1 = vector.load %arg2[%c0_1, %c0_2] : memref<128x128xf32, #tpu.memory_space<vmem>>, vector<128x128xf32>
    %cst = arith.constant dense<0.000000e+00> : vector<8x128xf32>
    %2 = tpu.matmul %0, %1, %cst {dimension_numbers = #tpu.dot_dimension_numbers<[1], [0], [0], [1], [0, 0, 1, 1], [], []>} : vector<8x128xf32>, vector<128x128xf32>, vector<8x128xf32> -> vector<8x128xf32>
    %c0_3 = arith.constant 0 : index
    %c0_4 = arith.constant 0 : index
    %3 = vector.load %arg5[%c0_3, %c0_4] : memref<3x128xf32, #tpu.memory_space<vmem>>, vector<1x128xf32>
    %4 = vector.broadcast %3 : vector<1x128xf32> to vector<8x128xf32>
    %5 = arith.addf %2, %4 : vector<8x128xf32>
    %cst_5 = arith.constant 0.000000e+00 : f32
    %6 = vector.broadcast %cst_5 : f32 to vector<8x128xf32>
    %7 = arith.maximumf %5, %6 : vector<8x128xf32>
    %c0_6 = arith.constant 0 : index
    %c0_7 = arith.constant 0 : index
    %8 = vector.load %arg3[%c0_6, %c0_7] : memref<128x128xf32, #tpu.memory_space<vmem>>, vector<128x128xf32>
    %cst_8 = arith.constant dense<0.000000e+00> : vector<8x128xf32>
    %9 = tpu.matmul %7, %8, %cst_8 {dimension_numbers = #tpu.dot_dimension_numbers<[1], [0], [0], [1], [0, 0, 1, 1], [], []>} : vector<8x128xf32>, vector<128x128xf32>, vector<8x128xf32> -> vector<8x128xf32>
    %c1 = arith.constant 1 : index
    %c0_9 = arith.constant 0 : index
    %10 = vector.load %arg5[%c1, %c0_9] : memref<3x128xf32, #tpu.memory_space<vmem>>, vector<1x128xf32>
    %11 = vector.broadcast %10 : vector<1x128xf32> to vector<8x128xf32>
    %12 = arith.addf %9, %11 : vector<8x128xf32>
    %c0_10 = arith.constant 0 : index
    %c0_11 = arith.constant 0 : index
    %13 = vector.load %arg4[%c0_10, %c0_11] : memref<128x128xf32, #tpu.memory_space<vmem>>, vector<128x128xf32>
    %cst_12 = arith.constant dense<0.000000e+00> : vector<8x128xf32>
    %14 = tpu.matmul %12, %13, %cst_12 {dimension_numbers = #tpu.dot_dimension_numbers<[1], [0], [0], [1], [0, 0, 1, 1], [], []>} : vector<8x128xf32>, vector<128x128xf32>, vector<8x128xf32> -> vector<8x128xf32>
    %c2 = arith.constant 2 : index
    %c0_13 = arith.constant 0 : index
    %15 = vector.load %arg5[%c2, %c0_13] : memref<3x128xf32, #tpu.memory_space<vmem>>, vector<1x128xf32>
    %16 = vector.broadcast %15 : vector<1x128xf32> to vector<8x128xf32>
    %17 = arith.addf %14, %16 : vector<8x128xf32>
    %c0_14 = arith.constant 0 : index
    %c0_15 = arith.constant 0 : index
    %18 = vector.load %arg6[%c0_14, %c0_15] : memref<8x128xf32, #tpu.memory_space<vmem>>, vector<8x128xf32>
    tpu.vector_store %arg6[%c0_14, %c0_15], %17 {strides = array<i32>} : memref<8x128xf32, #tpu.memory_space<vmem>>, vector<8x128xf32>,
    return
  }
  func.func @transform_0(%arg0: i32) -> (i32, i32) {
    %c0_i32 = arith.constant 0 : i32
    %c0_i32_0 = arith.constant 0 : i32
    return %arg0, %c0_i32 : i32, i32
  }
  func.func @transform_1(%arg0: i32) -> (i32, i32) {
    %c0_i32 = arith.constant 0 : i32
    %c0_i32_0 = arith.constant 0 : i32
    %c0_i32_1 = arith.constant 0 : i32
    return %c0_i32, %c0_i32_0 : i32, i32
  }
  func.func @transform_2(%arg0: i32) -> (i32, i32) {
    %c0_i32 = arith.constant 0 : i32
    %c0_i32_0 = arith.constant 0 : i32
    %c0_i32_1 = arith.constant 0 : i32
    return %c0_i32, %c0_i32_0 : i32, i32
  }
  func.func @transform_3(%arg0: i32) -> (i32, i32) {
    %c0_i32 = arith.constant 0 : i32
    %c0_i32_0 = arith.constant 0 : i32
    %c0_i32_1 = arith.constant 0 : i32
    return %c0_i32, %c0_i32_0 : i32, i32
  }
  func.func @transform_4(%arg0: i32) -> (i32, i32) {
    %c0_i32 = arith.constant 0 : i32
    %c0_i32_0 = arith.constant 0 : i32
    %c0_i32_1 = arith.constant 0 : i32
    return %c0_i32, %c0_i32_0 : i32, i32
  }
  func.func @transform_5(%arg0: i32) -> (i32, i32) {
    %c0_i32 = arith.constant 0 : i32
    %c0_i32_0 = arith.constant 0 : i32
    return %arg0, %c0_i32 : i32, i32
  }
}

</mosaic_0001>

<bundles_post_ra>
// kernel: tpu_custom_call.1
= control target key start
LH: loop header
LB: loop body
LE: loop exit
PB: predicated region body
PF: predicated region fallthrough
CT: control target
= control target key end

     0   :  { %7 = vsyncpa [#allocation3], 0  ;;  %s690_s0 = inlined_call_operand.hbm [shape: f32[16,128], index: 0, kind: input, shape index: {}]   ;;  %s691_s1 = inlined_call_operand.hbm [shape: f32[8,128], index: 1, kind: input, shape index: {}]   ;;  %s692_s2 = inlined_call_operand.hbm [shape: f32[16,128], index: 2, kind: output, shape index: {}]  }
   0x1   :  { %9 = vsyncpa [#allocation3 + $0x1], 0 }
   0x2   :  { %10 = vsyncpa [#allocation6], 0 }
   0x3   :  { %11 = vsyncpa [#allocation4], 0 }
   0x4   :  { %13 = vsyncpa [#allocation4 + $0x1], 0  ;;  %s489_s9 = smov 0   ;;  %s491_s10 = smov 0  }
   0x5   :  { %s493_s11 = smov 0   ;;  %s495_s12 = smov 0  }
   0x6 LB: > { %s510_s13 = sadd.s32 4294967295, %s469_s12   ;;  %s270_s14 = sadd.s32 4294967294, %s469_s12   ;;  %s469_s12 = sphi %s495_s12, %s716_s12   ;;  %s465_s11 = sphi %s493_s11, %s715_s11   ;;  %s461_s10 = sphi %s491_s10, %s714_s10   ;;  %s457_s9 = sphi %s489_s9, %s713_s9  }
   0x7   : > { %p39_p0 = scmp.ne.s32.totalorder %s461_s10, %s457_s9  ;;  %p693_p1 = scmp.eq.s32.totalorder %s510_s13, 0 }
   0x8   : > { %p90_p3 = scmp.eq.s32.totalorder %s270_s14, 1  ;;  %p271_p5 = scmp.ge.s32.totalorder %s469_s12, 1 }
   0x9   : > { %p519_p4 = por %p693_p1, %p39_p0  ;;  %p97_p7 = scmp.lt.s32.totalorder %s469_s12, 3 }
   0xa   : > { %p524_p6 = por %p90_p3, %p39_p0  ;;  %s471_s18 = smov [#allocation5]  }
   0xb   : > { %s696_s15 = scalar_select %p519_p4, 1, 0 }
   0xc   : > { %s697_s16 = scalar_select %p524_p6, 1, 0 }
   0xd   : > { %p529_p8 = pnand %p271_p5, %p97_p7  ;;  %s110_s19 = sshll.u32 %s471_s18, 4  ;;  %s111_s19 = int_to_ptr.vmem [resolvable:$true] %s110_s19 }
   0xe   : > { %s537_s20 = sadd.s32 1, %s469_s12   ;;  %s26_s24 = sadd.s32 1, %s465_s11 }
   0xf   : > { %s698_s17 = scalar_select %p529_p8, 1, 0 }
  0x10   : > { %p292_p10 = pneg %p529_p8  ;;  %s23_s22 = ssub.s32 %s469_s12, %s537_s20 }
  0x11   : > { %p547_p12 = scmp.eq.s32.totalorder %s23_s22, 0  ;;  %s341_s27 = scalar_lea.hbm %s691_s1, 128 }
  0x12   : > { %p541_p11 = pnand %p292_p10, %p693_p1  ;;  %p342_p0 = scmp.ne.s32.totalorder %s691_s1, %s341_s27 }
  0x13   : > { %s700_s23 = scalar_select %p547_p12, 1, 0 }
  0x14   : > { %p343_p3 = pneg %p541_p11  ;;  %p348_p10 = scmp.lt.u32.totalorder %s341_s27, %s691_s1 }
  0x16   : > { %p344_p5 = pnand %p343_p3, %p342_p0 }
  0x18   : > { %p345_p7 = pneg %p344_p5 }
  0x1a   : > { %p350_p9 = pnand %p348_p10, %p345_p7 }
  0x1c   : > { %353 = shalt.err (!%p350_p9)
}
  0x1d   : > { %s354_s4 = scalar_lea.vmem %s111_s19, 128  ;;  %p362_p6 = scmp.lt.s32.totalorder %s111_s19, %s111_s19 }
  0x1e   : > { %p355_p1 = scmp.ne.s32.totalorder %s111_s19, %s354_s4  ;;  %p363_p4 = scmp.lt.s32.totalorder %s354_s4, %s354_s4 }
  0x20   : > { %p357_p2 = pnand %p355_p1, %p343_p3  ;;  %p364_p8 = por %p363_p4, %p362_p6 }
  0x22   : > { %p358_p13 = pneg %p357_p2 }
  0x24   : > { %p365_p12 = pnand %p364_p8, %p358_p13 }
  0x26   : > { %368 = shalt.err (!%p365_p12)
}
  0x27   : > { %295 = dma.hbm_to_vmem [thread:$0]  (!%p541_p11), %s691_s1, 128, %s111_s19, [#allocation6]  }
  0x28   : > { %p701_p1 = scmp.ne.s32.totalorder %s700_s23, 0  ;;  %p34_p2 = scmp.eq.s32.totalorder %s469_s12, 0 }
  0x29   : > { %p702_p4 = scmp.ne.s32.totalorder %s465_s11, %s461_s10  ;;  %p703_p6 = scmp.eq.s32.totalorder %s510_s13, 1 }
  0x2a   : > { %s573_s7 = scalar_select %p701_p1, %s465_s11, %s26_s24  }
  0x2b   : > { %p581_p8 = por %p703_p6, %p702_p4  ;;  %p305_p9 = scmp.lt.s32.totalorder %s469_s12, 2 }
  0x2c   : > { %s121_s14 = sand.u32 1, %s465_s11   ;;  %p705_p12 = pmov %p702_p4 }
  0x2d   : > { %s274_s18 = sshll.u32 %s121_s14, 3  ;;  %s275_s21 = sshll.u32 %s469_s12, 7 }
  0x2e   : > { %p35_p13 = por %p34_p2, %p705_p12  ;;  %s594_s19 = scalar_lea.hbm %s690_s0, %s275_s21 }
  0x2f   : > { %s125_s23 = scalar_lea.vmem [#allocation2], %s274_s18  ;;  %s122_s27 = scalar_lea.sflag [#allocation3], %s121_s14 }
  0x30   : > { %s132_s24 = sshll.u32 %s125_s23, 4  ;;  %p596_p11 = pnand %p305_p9, %p35_p13  ;;  %s600_s24 = int_to_ptr.vmem [resolvable:$true] %s132_s24 }
  0x31   : > { %s369_s28 = scalar_lea.hbm %s594_s19, 128  ;;  %s374_s3 = scalar_lea.hbm %s690_s0, 256 }
  0x32   : > { %p370_p0 = scmp.ne.s32.totalorder %s594_s19, %s369_s28  ;;  %p371_p3 = pneg %p596_p11 }
  0x33   : > { %p375_p10 = scmp.lt.u32.totalorder %s594_s19, %s690_s0  ;;  %p376_p1 = scmp.lt.u32.totalorder %s374_s3, %s369_s28 }
  0x34   : > { %p372_p5 = pnand %p371_p3, %p370_p0  ;;  %p378_p4 = scmp.lt.u32.totalorder %s369_s28, %s594_s19 }
  0x35   : > { %p377_p2 = por %p376_p1, %p375_p10 }
  0x36   : > { %p373_p7 = pneg %p372_p5 }
  0x37   : > { %p379_p6 = por %p378_p4, %p377_p2 }
  0x39   : > { %p380_p9 = pnand %p379_p6, %p373_p7 }
  0x3b   : > { %383 = shalt.err (!%p380_p9)
}
  0x3c   : > { %s384_s6 = scalar_lea.vmem %s600_s24, 128  ;;  %s472_s14 = smov [#allocation2]  }
  0x3d   : > { %p385_p12 = scmp.ne.s32.totalorder %s600_s24, %s384_s6  ;;  %s389_s18 = sshll.u32 %s472_s14, 4  ;;  %s390_s18 = int_to_ptr.vmem [resolvable:$false] %s389_s18 }
  0x3e   : > { %s391_s21 = scalar_lea.vmem %s390_s18, 256  ;;  %p392_p5 = scmp.lt.s32.totalorder %s600_s24, %s390_s18 }
  0x3f   : > { %p387_p13 = pnand %p385_p12, %p371_p3  ;;  %p393_p10 = scmp.lt.s32.totalorder %s391_s21, %s384_s6 }
  0x41   : > { %p388_p0 = pneg %p387_p13  ;;  %p394_p1 = por %p393_p10, %p392_p5 }
  0x43   : > { %p395_p2 = pnand %p394_p1, %p388_p0 }
  0x45   : > { %398 = shalt.err (!%p395_p2)
}
  0x46   : > { %299 = dma.hbm_to_vmem [thread:$0]  (!%p596_p11), %s594_s19, 128, %s600_s24, %s122_s27  }
  0x47   : > { %p707_p7 = scmp.ne.s32.totalorder %s698_s17, 0 }
  0x48   : > { %s630_s22 = sand.u32 (!%p707_p7), 1, %s461_s10   ;;  %p708_p3 = scmp.ne.s32.totalorder (!%p707_p7), %s696_s15, 0 }
  0x49   : > { %141 = sbr.rel (%p707_p7) target bundleno = 109 (0x6d), region = 28  ;;  %s277_s25 = sshll.u32 (!%p707_p7), %s630_s22, 3 }
  0x4a   : > { %s144_s23 = scalar_lea.sflag (!%p707_p7), [#allocation3], %s630_s22  ;;  %s147_s28 = scalar_lea.vmem (!%p707_p7), [#allocation2], %s277_s25 }
  0x50   : > { %444 = dma.done.wait (%p708_p3), %s144_s23, 128  }
  0x51   : > { %446 = vsyncadd (%p708_p3), %s144_s23, 4294967168  ;;  %p709_p4 = scmp.eq.s32.totalorder %s510_s13, 0 }
  0x53   : > { %448 = dma.done.wait (%p709_p4), [#allocation6], 128   ;;  %p710_p11 = pmov %p709_p4 }
  0x54   : > { %s171_s17 = scalar_lea.vmem [#allocation7], %s277_s25  ;;  %s281_s24 = sshll.u32 %s510_s13, 7  ;;  %v172_v0 = vld [vmem:[%s147_s28] sm:$0xff]  ;;  %v173_v1 = vld [vmem:[#allocation5] sm:$0xff] }
  0x55   : > { %450 = vsyncadd (%p710_p11), [#allocation6], 4294967168  ;;  %s190_s19 = sshll.u32 %s171_s17, 4  ;;  %v174_v2 = vadd.f32 %v173_v1, %v172_v0  ;;  %s648_s27 = scalar_lea.hbm %s692_s2, %s281_s24  ;;  %s643_s19 = int_to_ptr.vmem [resolvable:$true] %s190_s19 }
  0x56   : > { %s177_s29 = scalar_lea.sflag [#allocation4], %s630_s22  ;;  %s399_s30 = scalar_lea.vmem %s643_s19, 128 }
  0x57   : > { %175 = vst [vmem:[%s171_s17] sm:$0xff] %v174_v2  ;;  %p400_p6 = scmp.ne.s32.totalorder %s643_s19, %s399_s30  ;;  %s473_s13 = smov [#allocation7]  }
  0x58   : > { %s403_s3 = sshll.u32 %s473_s13, 4  ;;  %s404_s3 = int_to_ptr.vmem [resolvable:$false] %s403_s3 }
  0x59   : > { %p401_p9 = pnand %p400_p6, %p581_p8  ;;  %s405_s4 = scalar_lea.vmem %s404_s3, 256 }
  0x5a   : > { %p406_p13 = scmp.lt.s32.totalorder %s643_s19, %s404_s3  ;;  %p407_p0 = scmp.lt.s32.totalorder %s405_s4, %s399_s30 }
  0x5b   : > { %p402_p12 = pneg %p401_p9 }
  0x5c   : > { %p408_p5 = por %p407_p0, %p406_p13 }
  0x5e   : > { %p409_p10 = pnand %p408_p5, %p402_p12 }
  0x60   : > { %412 = shalt.err (!%p409_p10)
}
  0x61   : > { %s413_s5 = scalar_lea.hbm %s648_s27, 128  ;;  %s417_s18 = scalar_lea.hbm %s692_s2, 256 }
  0x62   : > { %p414_p1 = scmp.ne.s32.totalorder %s648_s27, %s413_s5  ;;  %p418_p3 = scmp.lt.u32.totalorder %s648_s27, %s692_s2 }
  0x63   : > { %p419_p4 = scmp.lt.u32.totalorder %s417_s18, %s413_s5  ;;  %p421_p6 = scmp.lt.u32.totalorder %s413_s5, %s648_s27 }
  0x64   : > { %p415_p2 = pnand %p414_p1, %p581_p8 }
  0x65   : > { %p420_p11 = por %p419_p4, %p418_p3 }
  0x66   : > { %p416_p7 = pneg %p415_p2 }
  0x67   : > { %p422_p9 = por %p421_p6, %p420_p11 }
  0x69   : > { %p423_p12 = pnand %p422_p9, %p416_p7 }
  0x6b   : > { %426 = shalt.err (!%p423_p12)
}
  0x6c   : > { %290 = dma.vmem_to_hbm [thread:$0]  (%p581_p8), %s643_s19, 128, %s648_s27, %s177_s29  }
  0x6d PF: > { %s202_s25 = sand.u32 1, %s457_s9   ;;  %p711_p13 = scmp.ne.s32.totalorder %s697_s16, 0 }
  0x6e   : > { %p712_p0 = scmp.ge.s32.totalorder %s469_s12, 2  ;;  %s203_s23 = scalar_lea.sflag [#allocation4], %s202_s25 }
  0x70   : > { %p301_p5 = pnand %p712_p0, %p711_p13 }
  0x72   : > { %452 = dma.done.wait (!%p301_p5), %s203_s23, 128  }
  0x73   : > { %454 = vsyncadd (!%p301_p5), %s203_s23, 4294967168  ;;  %p16_p10 = scmp.ge.s32.totalorder %s537_s20, 4   ;;  %s713_s9 = smov %s461_s10 }
  0x74   : > { %s714_s10 = smov %s465_s11  ;;  %s715_s11 = smov %s573_s7 }
  0x75   : > { %s716_s12 = smov %s537_s20  ;;  %18 = sbr.rel (!%p16_p10) target bundleno = 6 (0x6), region = 77 }
  0x7c   :  { %208 = vsyncpa [#allocation3], 1 }
  0x7d   :  { %210 = vsyncpa [#allocation3 + $0x1], 1 }
  0x7e   :  { %211 = vsyncpa [#allocation6], 1 }
  0x7f   :  { %212 = vsyncpa [#allocation4], 1 }
  0x80   :  { %214 = vsyncpa [#allocation4 + $0x1], 1 }

// kernel: fc_forward.1
= control target key start
LH: loop header
LB: loop body
LE: loop exit
PB: predicated region body
PF: predicated region fallthrough
CT: control target
= control target key end

     0   :  { %10 = vsyncpa [#allocation3], 0  ;;  %s833_s0 = inlined_call_operand.vmem [shape: f32[8,128], index: 0, kind: input, shape index: {}]   ;;  %s834_s1 = inlined_call_operand.hbm [shape: f32[128,128], index: 1, kind: input, shape index: {}]   ;;  %s835_s2 = inlined_call_operand.hbm [shape: f32[128,128], index: 2, kind: input, shape index: {}]   ;;  %s836_s3 = inlined_call_operand.hbm [shape: f32[128,128], index: 3, kind: input, shape index: {}]   ;;  %s837_s4 = inlined_call_operand.vmem [shape: f32[3,128], index: 4, kind: input, shape index: {}]   ;;  %s838_s5 = inlined_call_operand.hbm [shape: f32[8,128], index: 5, kind: output, shape index: {}]  }
   0x1   :  { %11 = vsyncpa [#allocation6], 0 }
   0x2   :  { %12 = vsyncpa [#allocation4], 0  ;;  %s688_s18 = smov [#allocation5]   ;;  %s689_s20 = smov [#allocation2]  }
   0x3   :  { %s32_s19 = sshll.u32 %s688_s18, 4  ;;  %s20_s21 = sshll.u32 %s689_s20, 4  ;;  %s33_s19 = int_to_ptr.vmem [resolvable:$true] %s32_s19  ;;  %s727_s21 = int_to_ptr.vmem [resolvable:$true] %s20_s21 }
   0x4   :  { %s594_s24 = scalar_lea.hbm %s835_s2, 2048 }
   0x5   :  { %p595_p0 = scmp.ne.s32.totalorder %s835_s2, %s594_s24  ;;  %p598_p1 = scmp.lt.u32.totalorder %s594_s24, %s835_s2 }
   0x7   :  { %p600_p2 = pnand %p598_p1, %p595_p0 }
   0x9   :  { %603 = shalt.err (!%p600_p2)
}
   0xa   :  { %s604_s29 = scalar_lea.vmem %s33_s19, 2048  ;;  %p609_p4 = scmp.lt.s32.totalorder %s33_s19, %s33_s19 }
   0xb   :  { %p605_p3 = scmp.ne.s32.totalorder %s33_s19, %s604_s29  ;;  %p610_p5 = scmp.lt.s32.totalorder %s604_s29, %s604_s29 }
   0xd   :  { %p611_p6 = por %p610_p5, %p609_p4 }
   0xf   :  { %p612_p7 = pnand %p611_p6, %p605_p3 }
  0x11   :  { %615 = shalt.err (!%p612_p7)
}
  0x12   :  { %s690_s30 = smov 128   ;;  %s691_s6 = smov 8  }
  0x13   :  { %38 = dma.hbm_to_vmem [thread:$0]  %s835_s2, 2048, %s33_s19, [#allocation6], %s690_s30, %s690_s30, %s691_s6  }
  0x14   :  { %s616_s11 = scalar_lea.hbm %s834_s1, 2048 }
  0x15   :  { %p617_p8 = scmp.ne.s32.totalorder %s834_s1, %s616_s11  ;;  %p620_p9 = scmp.lt.u32.totalorder %s616_s11, %s834_s1 }
  0x17   :  { %p622_p10 = pnand %p620_p9, %p617_p8 }
  0x19   :  { %625 = shalt.err (!%p622_p10)
}
  0x1a   :  { %s626_s16 = scalar_lea.vmem %s727_s21, 2048  ;;  %p631_p12 = scmp.lt.s32.totalorder %s727_s21, %s727_s21 }
  0x1b   :  { %p627_p11 = scmp.ne.s32.totalorder %s727_s21, %s626_s16  ;;  %p632_p13 = scmp.lt.s32.totalorder %s626_s16, %s626_s16 }
  0x1d   :  { %p633_p0 = por %p632_p13, %p631_p12 }
  0x1f   :  { %p634_p1 = pnand %p633_p0, %p627_p11 }
  0x21   :  { %637 = shalt.err (!%p634_p1)
}
  0x22   :  { %26 = dma.hbm_to_vmem [thread:$0]  %s834_s1, 2048, %s727_s21, [#allocation3], %s690_s30, %s690_s30, %s691_s6  }
  0x23   :  { %s692_s18 = smov [#allocation7]   ;;  %s638_s23 = scalar_lea.hbm %s836_s3, 2048 }
  0x24   :  { %s44_s19 = sshll.u32 %s692_s18, 4  ;;  %p639_p2 = scmp.ne.s32.totalorder %s836_s3, %s638_s23  ;;  %s45_s19 = int_to_ptr.vmem [resolvable:$true] %s44_s19 }
  0x25   :  { %p642_p3 = scmp.lt.u32.totalorder %s638_s23, %s836_s3 }
  0x27   :  { %p644_p4 = pnand %p642_p3, %p639_p2 }
  0x29   :  { %647 = shalt.err (!%p644_p4)
}
  0x2a   :  { %s648_s28 = scalar_lea.vmem %s45_s19, 2048  ;;  %p653_p6 = scmp.lt.s32.totalorder %s45_s19, %s45_s19 }
  0x2b   :  { %p649_p5 = scmp.ne.s32.totalorder %s45_s19, %s648_s28  ;;  %p654_p7 = scmp.lt.s32.totalorder %s648_s28, %s648_s28 }
  0x2d   :  { %p655_p8 = por %p654_p7, %p653_p6 }
  0x2f   :  { %p656_p9 = pnand %p655_p8, %p649_p5 }
  0x31   :  { %659 = shalt.err (!%p656_p9)
}
  0x32   :  { %50 = dma.hbm_to_vmem [thread:$0]  %s836_s3, 2048, %s45_s19, [#allocation6], %s690_s30, %s690_s30, %s691_s6  }
  0x33   :  { %682 = dma.done.wait [#allocation3], 2048  }
  0x34   :  { %683 = vsyncadd [#allocation3], 4294965248 }
  0x35   :  { %684 = dma.done.wait [#allocation6], 4096  }
  0x36   :  { %685 = vsyncadd [#allocation6], 4294963200  ;;  %v693_v0 = vmov 0.0|0.0   ;;  %vm694_vm0 = vmmov 0   ;;  %v695_v1 = vmov 0.0   ;;  %v63_v2 = vld [vmem:[#allocation2] sm:$0xff] }
  0x37   :  { %513 = vmatprep.subr.bf16.mxu0 %v693_v0  ;;  %440 = vmatprep.mubr.msk.f32.mxu0 %vm694_vm0, %v695_v1  ;;  %v64_v3 = vld [vmem:[#allocation2 + $0x8] sm:$0xff]  ;;  %v65_v4 = vld [vmem:[#allocation2 + $0x10] sm:$0xff]  ;;  %v66_v6 = vld [vmem:[#allocation2 + $0x18] sm:$0xff]  ;;  %s696_s10 = smov [#allocation8]  }
  0x38   :  { %537 = vmatprep.subr.bf16.mxu1 %v693_v0  ;;  %475 = vmatprep.mubr.msk.f32.mxu1 %vm694_vm0, %v695_v1  ;;  %v514_v5 = vpack.c.bf16 %v64_v3, %v63_v2  ;;  %v517_v7 = vpack.c.bf16 %v66_v6, %v65_v4  ;;  %v67_v8 = vld [vmem:[#allocation2 + $0x20] sm:$0xff]  ;;  %v68_v9 = vld [vmem:[#allocation2 + $0x28] sm:$0xff]  ;;  %v157_v12 = vld [vmem:[#allocation5 + $0x10] sm:$0xff]  ;;  %s344_s11 = sshll.u32 %s696_s10, 4  ;;  %s345_s11 = int_to_ptr.vmem [resolvable:$true] %s344_s11 }
  0x39   :  { %v155_v10 = vld [vmem:[#allocation5] sm:$0xff]  ;;  %v156_v11 = vld [vmem:[#allocation5 + $0x8] sm:$0xff]  ;;  %v158_v13 = vld [vmem:[#allocation5 + $0x18] sm:$0xff]  ;;  %v520_v14 = vpack.c.bf16 %v68_v9, %v67_v8  ;;  %s660_s12 = scalar_lea.vmem %s345_s11, 128  ;;  %p665_p11 = scmp.lt.s32.totalorder %s345_s11, %s345_s11 }
  0x3a   :  { %515 = vmatpush3.bf16.msra.mxu0 %v514_v5  ;;  %v538_v15 = vpack.c.bf16 %v156_v11, %v155_v10  ;;  %v69_v16 = vld [vmem:[#allocation2 + $0x30] sm:$0xff]  ;;  %v70_v17 = vld [vmem:[#allocation2 + $0x38] sm:$0xff]  ;;  %v541_v18 = vpack.c.bf16 %v158_v13, %v157_v12  ;;  %v159_v19 = vld [vmem:[#allocation5 + $0x20] sm:$0xff]  ;;  %p661_p10 = scmp.ne.s32.totalorder %s345_s11, %s660_s12  ;;  %p666_p12 = scmp.lt.s32.totalorder %s660_s12, %s660_s12 }
  0x3b   :  { %516 = vmatprep.subr.bf16.mxu0 %v693_v0  ;;  %v160_v20 = vld [vmem:[#allocation5 + $0x28] sm:$0xff]  ;;  %v523_v21 = vpack.c.bf16 %v70_v17, %v69_v16  ;;  %v71_v22 = vld [vmem:[#allocation2 + $0x40] sm:$0xff]  ;;  %v161_v25 = vld [vmem:[#allocation5 + $0x30] sm:$0xff] }
  0x3c   :  { %539 = vmatpush3.bf16.msra.mxu1 %v538_v15  ;;  %v72_v23 = vld [vmem:[#allocation2 + $0x48] sm:$0xff]  ;;  %v544_v24 = vpack.c.bf16 %v160_v20, %v159_v19  ;;  %v162_v26 = vld [vmem:[#allocation5 + $0x38] sm:$0xff]  ;;  %v73_v28 = vld [vmem:[#allocation2 + $0x50] sm:$0xff]  ;;  %p667_p13 = por %p666_p12, %p665_p11 }
  0x3d   :  { %540 = vmatprep.subr.bf16.mxu1 %v693_v0  ;;  %v526_v27 = vpack.c.bf16 %v72_v23, %v71_v22  ;;  %v74_v29 = vld [vmem:[#allocation2 + $0x58] sm:$0xff]  ;;  %v547_v30 = vpack.c.bf16 %v162_v26, %v161_v25  ;;  %v163_v31 = vld [vmem:[#allocation5 + $0x40] sm:$0xff]  ;;  %v164_v32 = vld [vmem:[#allocation5 + $0x48] sm:$0xff] }
  0x3e   :  { %518 = vmatpush3.bf16.msra.mxu0 %v517_v7  ;;  %v529_v33 = vpack.c.bf16 %v74_v29, %v73_v28  ;;  %v75_v34 = vld [vmem:[#allocation2 + $0x60] sm:$0xff]  ;;  %v76_v35 = vld [vmem:[#allocation2 + $0x68] sm:$0xff]  ;;  %v550_v36 = vpack.c.bf16 %v164_v32, %v163_v31  ;;  %v165_v37 = vld [vmem:[#allocation5 + $0x50] sm:$0xff]  ;;  %p668_p0 = pnand %p667_p13, %p661_p10 }
  0x3f   :  { %519 = vmatprep.subr.bf16.mxu0 %v693_v0  ;;  %v166_v38 = vld [vmem:[#allocation5 + $0x58] sm:$0xff]  ;;  %v532_v39 = vpack.c.bf16 %v76_v35, %v75_v34  ;;  %v77_v40 = vld [vmem:[#allocation2 + $0x70] sm:$0xff]  ;;  %v167_v43 = vld [vmem:[#allocation5 + $0x60] sm:$0xff] }
  0x40   :  { %542 = vmatpush3.bf16.msra.mxu1 %v541_v18  ;;  %v78_v41 = vld [vmem:[#allocation2 + $0x78] sm:$0xff]  ;;  %v553_v42 = vpack.c.bf16 %v166_v38, %v165_v37  ;;  %v168_v44 = vld [vmem:[#allocation5 + $0x68] sm:$0xff]  ;;  %v62_v47 = vld [vmem:[%s833_s0] sm:$0xff] }
  0x41   :  { %543 = vmatprep.subr.bf16.mxu1 %v693_v0  ;;  %v535_v45 = vpack.c.bf16 %v78_v41, %v77_v40  ;;  %v556_v46 = vpack.c.bf16 %v168_v44, %v167_v43  ;;  %v169_v48 = vld [vmem:[#allocation5 + $0x70] sm:$0xff]  ;;  %v170_v49 = vld [vmem:[#allocation5 + $0x78] sm:$0xff]  ;;  %v246_v51 = vld [vmem:[#allocation7] sm:$0xff] }
  0x42   :  { %521 = vmatpush3.bf16.msra.mxu0 %v520_v14  ;;  %v559_v50 = vpack.c.bf16 %v170_v49, %v169_v48  ;;  %v247_v52 = vld [vmem:[#allocation7 + $0x8] sm:$0xff]  ;;  %v248_v53 = vld [vmem:[#allocation7 + $0x10] sm:$0xff]  ;;  %v249_v55 = vld [vmem:[#allocation7 + $0x18] sm:$0xff] }
  0x43   :  { %522 = vmatprep.subr.bf16.mxu0 %v693_v0  ;;  %v562_v54 = vpack.c.bf16 %v247_v52, %v246_v51  ;;  %v565_v56 = vpack.c.bf16 %v249_v55, %v248_v53  ;;  %v250_v57 = vld [vmem:[#allocation7 + $0x20] sm:$0xff]  ;;  %v251_v58 = vld [vmem:[#allocation7 + $0x28] sm:$0xff]  ;;  %v252_v60 = vld [vmem:[#allocation7 + $0x30] sm:$0xff] }
  0x44   :  { %545 = vmatpush3.bf16.msra.mxu1 %v544_v24  ;;  %v568_v59 = vpack.c.bf16 %v251_v58, %v250_v57  ;;  %v253_v61 = vld [vmem:[#allocation7 + $0x38] sm:$0xff]  ;;  %v254_v63 = vld [vmem:[#allocation7 + $0x40] sm:$0xff]  ;;  %v256_v3 = vld [vmem:[#allocation7 + $0x50] sm:$0xff] }
  0x45   :  { %546 = vmatprep.subr.bf16.mxu1 %v693_v0  ;;  %v571_v62 = vpack.c.bf16 %v253_v61, %v252_v60  ;;  %v257_v4 = vld [vmem:[#allocation7 + $0x58] sm:$0xff]  ;;  %v258_v6 = vld [vmem:[#allocation7 + $0x60] sm:$0xff]  ;;  %v259_v7 = vld [vmem:[#allocation7 + $0x68] sm:$0xff] }
  0x46   :  { %524 = vmatpush3.bf16.msra.mxu0 %v523_v21  ;;  %v577_v5 = vpack.c.bf16 %v257_v4, %v256_v3  ;;  %v580_v8 = vpack.c.bf16 %v259_v7, %v258_v6  ;;  %v354_v9 = vld [vmem:[%s837_s4] ss:$0 sm:$0xff]  ;;  %v260_v14 = vld [vmem:[#allocation7 + $0x70] sm:$0xff]  ;;  %v261_v15 = vld [vmem:[#allocation7 + $0x78] sm:$0xff] }
  0x47   :  { %525 = vmatprep.subr.bf16.mxu0 %v693_v0  ;;  %v583_v16 = vpack.c.bf16 %v261_v15, %v260_v14  ;;  %v355_v17 = vld [vmem:[%s837_s4 + $0x1] ss:$0 sm:$0xff]  ;;  %v356_v20 = vld [vmem:[%s837_s4 + $0x2] ss:$0 sm:$0xff] }
  0x48   :  { %548 = vmatpush3.bf16.msra.mxu1 %v547_v30 }
  0x49   :  { %549 = vmatprep.subr.bf16.mxu1 %v693_v0 }
  0x4a   :  { %527 = vmatpush3.bf16.msra.mxu0 %v526_v27 }
  0x4b   :  { %528 = vmatprep.subr.bf16.mxu0 %v693_v0 }
  0x4c   :  { %551 = vmatpush3.bf16.msra.mxu1 %v550_v36 }
  0x4d   :  { %552 = vmatprep.subr.bf16.mxu1 %v693_v0 }
  0x4e   :  { %530 = vmatpush3.bf16.msra.mxu0 %v529_v33 }
  0x4f   :  { %531 = vmatprep.subr.bf16.mxu0 %v693_v0 }
  0x50   :  { %554 = vmatpush3.bf16.msra.mxu1 %v553_v42 }
  0x51   :  { %555 = vmatprep.subr.bf16.mxu1 %v693_v0 }
  0x52   :  { %533 = vmatpush3.bf16.msra.mxu0 %v532_v39 }
  0x53   :  { %534 = vmatprep.subr.bf16.mxu0 %v693_v0 }
  0x54   :  { %557 = vmatpush3.bf16.msra.mxu1 %v556_v46 }
  0x55   :  { %558 = vmatprep.subr.bf16.mxu1 %v693_v0 }
  0x56   :  { %536 = vmatpush3.bf16.msra.mxu0 %v535_v45 }
  0x57   :  { %561 = vmatprep.subr.bf16.mxu0 %v693_v0 }
  0x58   :  { %560 = vmatpush3.bf16.msra.mxu1 %v559_v50 }
  0x59   :  { %441 = vmatmul.mubr.f32.vlgmr.msra.gmra.mrb[0].mxu0 %v62_v47 }
  0x5a   :  { %510 = vmatprep.mubr.msk.f32.mxu0 %vm694_vm0, %v695_v1  ;;  %563 = vmatpush3.bf16.msra.mxu0 %v562_v54  ;;  %v255_v1 = vld [vmem:[#allocation7 + $0x48] sm:$0xff] }
  0x5b   :  { %564 = vmatprep.subr.bf16.mxu0 %v693_v0  ;;  %v574_v2 = vpack.c.bf16 %v255_v1, %v254_v63 }
  0x5e   :  { %566 = vmatpush3.bf16.msra.mxu0 %v565_v56 }
  0x5f   :  { %567 = vmatprep.subr.bf16.mxu0 %v693_v0 }
  0x62   :  { %569 = vmatpush3.bf16.msra.mxu0 %v568_v59 }
  0x63   :  { %570 = vmatprep.subr.bf16.mxu0 %v693_v0 }
  0x66   :  { %572 = vmatpush3.bf16.msra.mxu0 %v571_v62 }
  0x67   :  { %573 = vmatprep.subr.bf16.mxu0 %v693_v0 }
  0x6a   :  { %575 = vmatpush3.bf16.msra.mxu0 %v574_v2 }
  0x6b   :  { %576 = vmatprep.subr.bf16.mxu0 %v693_v0 }
  0x6e   :  { %578 = vmatpush3.bf16.msra.mxu0 %v577_v5 }
  0x6f   :  { %579 = vmatprep.subr.bf16.mxu0 %v693_v0 }
  0x72   :  { %581 = vmatpush3.bf16.msra.mxu0 %v580_v8 }
  0x73   :  { %582 = vmatprep.subr.bf16.mxu0 %v693_v0 }
  0x76   :  { %584 = vmatpush3.bf16.msra.mxu0 %v583_v16 }
 0x12c   :  { %v150_v10 = vpop.f32.mrb[0].mxu0 }
 0x12d   :  { %v151_v11 = vadd.f32 %v354_v9, %v150_v10  ;;  %v442_v12 = vpop.f32.mrb[1].mxu0 }
 0x12f   :  { %v154_v13 = vmax.f32 %v151_v11, 0.0 }
 0x131   :  { %476 = vmatmul.mubr.f32.vlgmr.msra.gmra.mrb[0].mxu1 %v154_v13 }
 0x204   :  { %v242_v18 = vpop.f32.mrb[0].mxu1 }
 0x205   :  { %v243_v19 = vadd.f32 %v355_v17, %v242_v18  ;;  %v477_v0 = vpop.f32.mrb[1].mxu1 }
 0x207   :  { %511 = vmatmul.mubr.f32.vlgmr.msra.gmra.mrb[2].mxu0 %v243_v19 }
 0x2da   :  { %v333_v21 = vpop.f32.mrb[2].mxu0 }
 0x2db   :  { %v334_v22 = vadd.f32 %v356_v20, %v333_v21  ;;  %v512_v23 = vpop.f32.mrb[3].mxu0 }
 0x2dd   :  { %337 = vst [vmem:[#allocation8] sm:$0xff] %v334_v22 }
 0x2de   :  { %671 = shalt.err (!%p668_p0)
}
 0x2df   :  { %s672_s15 = scalar_lea.hbm %s838_s5, 128 }
 0x2e0   :  { %p673_p1 = scmp.ne.s32.totalorder %s838_s5, %s672_s15  ;;  %p676_p2 = scmp.lt.u32.totalorder %s672_s15, %s838_s5 }
 0x2e2   :  { %p678_p3 = pnand %p676_p2, %p673_p1 }
 0x2e4   :  { %681 = shalt.err (!%p678_p3)
}
 0x2e5   :  { %347 = dma.vmem_to_hbm [thread:$0]  %s345_s11, 128, %s838_s5, [#allocation4]  }
 0x2e6   :  { %686 = dma.done.wait [#allocation4], 128  }
 0x2e7   :  { %687 = vsyncadd [#allocation4], 4294967168 }
 0x2e8   :  { %351 = vsyncpa [#allocation3], 1 }
 0x2e9   :  { %352 = vsyncpa [#allocation6], 1 }
 0x2ea   :  { %353 = vsyncpa [#allocation4], 1 }

</bundles_post_ra>
